<compile_context>
chip_gen: v5e
topology: v5e:2x2
jax: 0.10.0
libtpu: 0.0.40
codegen_flags: <defaults>
</compile_context>

<pallas_src>
import functools

import jax
import jax.numpy as jnp
from jax.experimental import pallas as pl
from jax.experimental.pallas import tpu as pltpu


def _round_up(x: int, m: int) -> int:
    return (x + m - 1) // m * m


def _mlp_fused_kernel(x_ref, *rest, num_layers: int, sigmoid_output: bool):
    """Whole MLP in one body: h = x; for each layer h = act(h @ W + b)."""
    o_ref = rest[-1]
    wb_refs = rest[:-1]  # w0, b0, w1, b1, ...
    h = x_ref[...]  # (tm, Kp) f32
    for i in range(num_layers):
        w = wb_refs[2 * i][...]        # (Kp_i, Np_i) bf16, resident in VMEM
        b = wb_refs[2 * i + 1][...]    # (1, Np_i)   f32
        y = jnp.dot(h.astype(jnp.bfloat16), w,
                    preferred_element_type=jnp.float32)
        y = y + b                      # broadcasts over rows, f32 epilogue
        if i < num_layers - 1:
            y = jnp.maximum(y, 0.0)
        h = y
    if sigmoid_output:
        h = jax.nn.sigmoid(h)
    o_ref[...] = h.astype(o_ref.dtype)


def mlp_fused_pallas(x_pad, weights, biases, *, num_layers: int,
                     sigmoid_output: bool, tm: int):
    """x_pad: (Mp, Kp) f32, Mp % tm == 0, Kp % 128 == 0.
    weights[i]: (Kp_i, Np_i) bf16 padded; biases[i]: (1, Np_i) f32 padded."""
    m_pad, k_pad = x_pad.shape
    n_last = weights[-1].shape[1]
    grid = (m_pad // tm,)

    in_specs = [pl.BlockSpec((tm, k_pad), lambda i: (i, 0))]
    inputs = [x_pad]
    for w, b in zip(weights, biases):
        kin, kout = w.shape
        in_specs.append(pl.BlockSpec((kin, kout), lambda i: (0, 0)))
        in_specs.append(pl.BlockSpec((1, kout), lambda i: (0, 0)))
        inputs.append(w)
        inputs.append(b)

    kernel = functools.partial(_mlp_fused_kernel, num_layers=num_layers,
                               sigmoid_output=sigmoid_output)
    return pl.pallas_call(
        kernel,
        out_shape=jax.ShapeDtypeStruct((m_pad, n_last), x_pad.dtype),
        grid_spec=pltpu.PrefetchScalarGridSpec(
            num_scalar_prefetch=0,
            grid=grid,
            in_specs=in_specs,
            out_specs=pl.BlockSpec((tm, n_last), lambda i: (i, 0)),
        ),
        compiler_params=pltpu.CompilerParams(
            dimension_semantics=("parallel",),  # M tiles shard across TCs
        ),
    )(*inputs)


class MLPPallas:
    """Mirror of the PyTorch MLP: num_layers Linear layers, ReLU between,
    optional sigmoid on the output. One fused Pallas kernel per forward."""

    # Rows per M tile when batch is large; small batches use a single tile.
    # (Sized so activation tiles + resident padded weights fit v7x's 64 MiB
    #  VMEM with double-buffered input/output streams.)
    TM_MAX = 512

    def __init__(self, input_dim, hidden_dim, output_dim, num_layers,
                 sigmoid_output=False, key=None):
        self.num_layers = num_layers
        self.sigmoid_output = sigmoid_output
        self.input_dim = input_dim
        self.output_dim = output_dim

        h = [hidden_dim] * (num_layers - 1)
        dims = list(zip([input_dim] + h, h + [output_dim]))
        if key is None:
            key = jax.random.PRNGKey(0)

        self.pad_in = _round_up(input_dim, 128)

        self.params = []       # unpadded f32 (w:(in,out), b:(out,)) for reference
        self.w_padded = []     # lane-dense padded, bf16, (Kp, Np)
        self.b_padded = []     # lane-dense padded, f32, (1, Np)
        for (n_in, n_out) in dims:
            key, kw, kb = jax.random.split(key, 3)
            # Deterministic init mimicking nn.Linear's uniform(-1/sqrt(in), 1/sqrt(in)).
            bound = 1.0 / (n_in ** 0.5)
            # PyTorch weight shape is (out, in); store transposed (in, out).
            w = jax.random.uniform(kw, (n_in, n_out), jnp.float32, -bound, bound)
            b = jax.random.uniform(kb, (n_out,), jnp.float32, -bound, bound)
            self.params.append((w, b))

            kp, np_ = _round_up(n_in, 128), _round_up(n_out, 128)
            wp = jnp.zeros((kp, np_), jnp.float32).at[:n_in, :n_out].set(w)
            bp = jnp.zeros((1, np_), jnp.float32).at[0, :n_out].set(b)
            # Weights fed to the MXU in bf16; bias stays f32 for the epilogue.
            self.w_padded.append(wp.astype(jnp.bfloat16))
            self.b_padded.append(bp)

    def __call__(self, x):
        M, K = x.shape
        assert K == self.input_dim, (K, self.input_dim)

        # Tile only M; pad rows to the tiling granularity (zeros -> discarded).
        if M <= self.TM_MAX:
            m_pad = _round_up(M, 8)
            tm = m_pad
        else:
            m_pad = _round_up(M, self.TM_MAX)
            tm = self.TM_MAX

        # Zero-pad features to 128 lanes (padded cols stay exactly zero through
        # every layer because padded weight rows/cols and bias lanes are zero).
        x_pad = jnp.zeros((m_pad, self.pad_in), x.dtype).at[:M, :K].set(x)

        out_pad = mlp_fused_pallas(
            x_pad, self.w_padded, self.b_padded,
            num_layers=self.num_layers, sigmoid_output=self.sigmoid_output,
            tm=tm)
        return out_pad[:M, :self.output_dim]

    def reference(self, x):
        """Pure-JAX f32 reference matching the PyTorch forward."""
        for i, (w, b) in enumerate(self.params):
            y = x @ w + b
            if i < self.num_layers - 1:
                y = jnp.maximum(y, 0.0)
            x = y
        if self.sigmoid_output:
            x = jax.nn.sigmoid(x)
        return x


if __name__ == "__main__":
    key = jax.random.PRNGKey(0)
    k_x, k_p = jax.random.split(key)

    batch, input_dim, hidden_dim, output_dim, num_layers = 8, 32, 64, 16, 3
    x = jax.random.normal(k_x, (batch, input_dim), jnp.float32)

    mlp = MLPPallas(input_dim, hidden_dim, output_dim, num_layers,
                    sigmoid_output=True, key=k_p)

    out = mlp(x)
    out = jax.block_until_ready(out)

    ref = mlp.reference(x)
    assert out.shape == (batch, output_dim), out.shape
    # bf16 MXU feed -> compare against the f32 reference with a widened tolerance.
    assert jnp.allclose(out, ref, atol=2e-2, rtol=2e-2), (
        float(jnp.max(jnp.abs(out - ref))))

    print("KERNEL_OK")
</pallas_src>

<mosaic_0001>
module attributes {stable_mosaic.version = 11 : i64} {
  func.func @_mlp_fused_kernel(%arg0: i32, %arg1: memref<8x128xf32, #tpu.memory_space<vmem>>, %arg2: memref<128x128xbf16, #tpu.memory_space<vmem>>, %arg3: memref<1x128xf32, #tpu.memory_space<vmem>>, %arg4: memref<128x128xbf16, #tpu.memory_space<vmem>>, %arg5: memref<1x128xf32, #tpu.memory_space<vmem>>, %arg6: memref<128x128xbf16, #tpu.memory_space<vmem>>, %arg7: memref<1x128xf32, #tpu.memory_space<vmem>>, %arg8: memref<8x128xf32, #tpu.memory_space<vmem>>) attributes {dimension_semantics = [#tpu.dimension_semantics<parallel>], iteration_bounds = array<i64: 1>, scalar_prefetch = 0 : i64, scratch_operands = 0 : i64, tpu.core_type = #tpu.core_type<tc>, window_params = [{transform_indices = @transform_0, window_bounds = array<i64: 8, 128>}, {pipeline_mode = #tpu.pipeline_mode<synchronous>, transform_indices = @transform_1, window_bounds = array<i64: 128, 128>}, {pipeline_mode = #tpu.pipeline_mode<synchronous>, transform_indices = @transform_2, window_bounds = array<i64: 1, 128>}, {pipeline_mode = #tpu.pipeline_mode<synchronous>, transform_indices = @transform_3, window_bounds = array<i64: 128, 128>}, {pipeline_mode = #tpu.pipeline_mode<synchronous>, transform_indices = @transform_4, window_bounds = array<i64: 1, 128>}, {pipeline_mode = #tpu.pipeline_mode<synchronous>, transform_indices = @transform_5, window_bounds = array<i64: 128, 128>}, {pipeline_mode = #tpu.pipeline_mode<synchronous>, transform_indices = @transform_6, window_bounds = array<i64: 1, 128>}, {transform_indices = @transform_7, window_bounds = array<i64: 8, 128>}]} {
    %c0 = arith.constant 0 : index
    %c0_0 = arith.constant 0 : index
    %0 = vector.load %arg1[%c0, %c0_0] : memref<8x128xf32, #tpu.memory_space<vmem>>, vector<8x128xf32>
    %c0_1 = arith.constant 0 : index
    %c0_2 = arith.constant 0 : index
    %1 = vector.load %arg2[%c0_1, %c0_2] : memref<128x128xbf16, #tpu.memory_space<vmem>>, vector<128x128xbf16>
    %c0_3 = arith.constant 0 : index
    %c0_4 = arith.constant 0 : index
    %2 = vector.load %arg3[%c0_3, %c0_4] : memref<1x128xf32, #tpu.memory_space<vmem>>, vector<1x128xf32>
    %3 = arith.truncf %0 : vector<8x128xf32> to vector<8x128xbf16>
    %cst = arith.constant dense<0.000000e+00> : vector<8x128xf32>
    %4 = tpu.matmul %3, %1, %cst {dimension_numbers = #tpu.dot_dimension_numbers<[1], [0], [0], [1], [0, 0, 1, 1], [], []>} : vector<8x128xbf16>, vector<128x128xbf16>, vector<8x128xf32> -> vector<8x128xf32>
    %5 = vector.broadcast %2 : vector<1x128xf32> to vector<8x128xf32>
    %6 = arith.addf %4, %5 : vector<8x128xf32>
    %cst_5 = arith.constant 0.000000e+00 : f32
    %7 = vector.broadcast %cst_5 : f32 to vector<8x128xf32>
    %8 = arith.maximumf %6, %7 : vector<8x128xf32>
    %c0_6 = arith.constant 0 : index
    %c0_7 = arith.constant 0 : index
    %9 = vector.load %arg4[%c0_6, %c0_7] : memref<128x128xbf16, #tpu.memory_space<vmem>>, vector<128x128xbf16>
    %c0_8 = arith.constant 0 : index
    %c0_9 = arith.constant 0 : index
    %10 = vector.load %arg5[%c0_8, %c0_9] : memref<1x128xf32, #tpu.memory_space<vmem>>, vector<1x128xf32>
    %11 = arith.truncf %8 : vector<8x128xf32> to vector<8x128xbf16>
    %cst_10 = arith.constant dense<0.000000e+00> : vector<8x128xf32>
    %12 = tpu.matmul %11, %9, %cst_10 {dimension_numbers = #tpu.dot_dimension_numbers<[1], [0], [0], [1], [0, 0, 1, 1], [], []>} : vector<8x128xbf16>, vector<128x128xbf16>, vector<8x128xf32> -> vector<8x128xf32>
    %13 = vector.broadcast %10 : vector<1x128xf32> to vector<8x128xf32>
    %14 = arith.addf %12, %13 : vector<8x128xf32>
    %cst_11 = arith.constant 0.000000e+00 : f32
    %15 = vector.broadcast %cst_11 : f32 to vector<8x128xf32>
    %16 = arith.maximumf %14, %15 : vector<8x128xf32>
    %c0_12 = arith.constant 0 : index
    %c0_13 = arith.constant 0 : index
    %17 = vector.load %arg6[%c0_12, %c0_13] : memref<128x128xbf16, #tpu.memory_space<vmem>>, vector<128x128xbf16>
    %c0_14 = arith.constant 0 : index
    %c0_15 = arith.constant 0 : index
    %18 = vector.load %arg7[%c0_14, %c0_15] : memref<1x128xf32, #tpu.memory_space<vmem>>, vector<1x128xf32>
    %19 = arith.truncf %16 : vector<8x128xf32> to vector<8x128xbf16>
    %cst_16 = arith.constant dense<0.000000e+00> : vector<8x128xf32>
    %20 = tpu.matmul %19, %17, %cst_16 {dimension_numbers = #tpu.dot_dimension_numbers<[1], [0], [0], [1], [0, 0, 1, 1], [], []>} : vector<8x128xbf16>, vector<128x128xbf16>, vector<8x128xf32> -> vector<8x128xf32>
    %21 = vector.broadcast %18 : vector<1x128xf32> to vector<8x128xf32>
    %22 = arith.addf %20, %21 : vector<8x128xf32>
    %23 = arith.negf %22 : vector<8x128xf32>
    %24 = math.exp %23 : vector<8x128xf32>
    %cst_17 = arith.constant 1.000000e+00 : f32
    %25 = vector.broadcast %cst_17 : f32 to vector<8x128xf32>
    %26 = arith.addf %25, %24 : vector<8x128xf32>
    %27 = arith.divf %25, %26 : vector<8x128xf32>
    %c0_18 = arith.constant 0 : index
    %c0_19 = arith.constant 0 : index
    %28 = vector.load %arg8[%c0_18, %c0_19] : memref<8x128xf32, #tpu.memory_space<vmem>>, vector<8x128xf32>
    tpu.vector_store %arg8[%c0_18, %c0_19], %27 {strides = array<i32>} : memref<8x128xf32, #tpu.memory_space<vmem>>, vector<8x128xf32>,
    return
  }
  func.func @transform_0(%arg0: i32) -> (i32, i32) {
    %c0_i32 = arith.constant 0 : i32
    %c0_i32_0 = arith.constant 0 : i32
    return %arg0, %c0_i32 : i32, i32
  }
  func.func @transform_1(%arg0: i32) -> (i32, i32) {
    %c0_i32 = arith.constant 0 : i32
    %c0_i32_0 = arith.constant 0 : i32
    %c0_i32_1 = arith.constant 0 : i32
    return %c0_i32, %c0_i32_0 : i32, i32
  }
  func.func @transform_2(%arg0: i32) -> (i32, i32) {
    %c0_i32 = arith.constant 0 : i32
    %c0_i32_0 = arith.constant 0 : i32
    %c0_i32_1 = arith.constant 0 : i32
    return %c0_i32, %c0_i32_0 : i32, i32
  }
  func.func @transform_3(%arg0: i32) -> (i32, i32) {
    %c0_i32 = arith.constant 0 : i32
    %c0_i32_0 = arith.constant 0 : i32
    %c0_i32_1 = arith.constant 0 : i32
    return %c0_i32, %c0_i32_0 : i32, i32
  }
  func.func @transform_4(%arg0: i32) -> (i32, i32) {
    %c0_i32 = arith.constant 0 : i32
    %c0_i32_0 = arith.constant 0 : i32
    %c0_i32_1 = arith.constant 0 : i32
    return %c0_i32, %c0_i32_0 : i32, i32
  }
  func.func @transform_5(%arg0: i32) -> (i32, i32) {
    %c0_i32 = arith.constant 0 : i32
    %c0_i32_0 = arith.constant 0 : i32
    %c0_i32_1 = arith.constant 0 : i32
    return %c0_i32, %c0_i32_0 : i32, i32
  }
  func.func @transform_6(%arg0: i32) -> (i32, i32) {
    %c0_i32 = arith.constant 0 : i32
    %c0_i32_0 = arith.constant 0 : i32
    %c0_i32_1 = arith.constant 0 : i32
    return %c0_i32, %c0_i32_0 : i32, i32
  }
  func.func @transform_7(%arg0: i32) -> (i32, i32) {
    %c0_i32 = arith.constant 0 : i32
    %c0_i32_0 = arith.constant 0 : i32
    return %arg0, %c0_i32 : i32, i32
  }
}

</mosaic_0001>

<bundles_post_ra>
// kernel: tpu_custom_call.1
= control target key start
LH: loop header
LB: loop body
LE: loop exit
PB: predicated region body
PF: predicated region fallthrough
CT: control target
= control target key end

     0   :  { %12 = vsyncpa [#allocation3], 0  ;;  %s710_s0 = inlined_call_operand.hbm [shape: f32[8,128], index: 0, kind: input, shape index: {}]   ;;  %s711_s1 = inlined_call_operand.hbm [shape: bf16[128,128], index: 1, kind: input, shape index: {}]   ;;  %s712_s2 = inlined_call_operand.vmem [shape: f32[1,128], index: 2, kind: input, shape index: {}]   ;;  %s713_s3 = inlined_call_operand.hbm [shape: bf16[128,128], index: 3, kind: input, shape index: {}]   ;;  %s714_s4 = inlined_call_operand.vmem [shape: f32[1,128], index: 4, kind: input, shape index: {}]   ;;  %s715_s5 = inlined_call_operand.hbm [shape: bf16[128,128], index: 5, kind: input, shape index: {}]   ;;  %s716_s6 = inlined_call_operand.vmem [shape: f32[1,128], index: 6, kind: input, shape index: {}]   ;;  %s717_s7 = inlined_call_operand.hbm [shape: f32[8,128], index: 7, kind: output, shape index: {}]  }
   0x1   :  { %13 = vsyncpa [#allocation6], 0 }
   0x2   :  { %14 = vsyncpa [#allocation9], 0  ;;  %s31_s26 = sshll.u32 %s711_s1, 4  ;;  %s32_s26 = int_to_ptr.hbm [resolvable:$true] %s31_s26 }
   0x3   :  { %15 = vsyncpa [#allocation4], 0  ;;  %s639_s27 = smov [#allocation5]   ;;  %s21_s8 = sshll.u32 %s710_s0, 4  ;;  %s22_s8 = int_to_ptr.hbm [resolvable:$true] %s21_s8 }
   0x4   :  { %s33_s28 = sshll.u32 %s639_s27, 4  ;;  %s640_s9 = smov 64   ;;  %s34_s28 = int_to_ptr.vmem [resolvable:$true] %s33_s28 }
   0x5   :  { %s641_s10 = smov 4   ;;  %s642_s11 = smov [#allocation2]  }
   0x6   :  { %39 = dma.hbm_to_vmem [thread:$0]  %s32_s26, 1024, %s34_s28, [#allocation6], %s640_s9, %s640_s9, %s641_s10  }
   0x7   :  { %s23_s12 = sshll.u32 %s642_s11, 4  ;;  %s46_s15 = sshll.u32 %s713_s3, 4  ;;  %s24_s12 = int_to_ptr.vmem [resolvable:$true] %s23_s12  ;;  %s47_s15 = int_to_ptr.hbm [resolvable:$true] %s46_s15 }
   0x8   :  { %26 = dma.hbm_to_vmem [thread:$0]  %s22_s8, 128, %s24_s12, [#allocation3]  }
   0x9   :  { %s61_s17 = sshll.u32 %s715_s5, 4  ;;  %s643_s18 = smov [#allocation7]   ;;  %s62_s17 = int_to_ptr.hbm [resolvable:$true] %s61_s17 }
   0xa   :  { %s48_s19 = sshll.u32 %s643_s18, 4  ;;  %s644_s0 = smov [#allocation8]   ;;  %s49_s19 = int_to_ptr.vmem [resolvable:$true] %s48_s19 }
   0xb   :  { %54 = dma.hbm_to_vmem [thread:$0]  %s47_s15, 1024, %s49_s19, [#allocation6], %s640_s9, %s640_s9, %s641_s10  }
   0xc   :  { %s63_s20 = sshll.u32 %s644_s0, 4  ;;  %s64_s20 = int_to_ptr.vmem [resolvable:$true] %s63_s20 }
   0xd   :  { %69 = dma.hbm_to_vmem [thread:$0]  %s62_s17, 1024, %s64_s20, [#allocation9], %s640_s9, %s640_s9, %s641_s10  }
   0xe   :  { %631 = dma.done.wait [#allocation3], 128  }
   0xf   :  { %632 = vsyncadd [#allocation3], 4294967168 }
  0x10   :  { %633 = dma.done.wait [#allocation6], 2048  }
  0x11   :  { %634 = vsyncadd [#allocation6], 4294965248 }
  0x12   :  { %635 = dma.done.wait [#allocation9], 1024  }
  0x13   :  { %636 = vsyncadd [#allocation9], 4294966272  ;;  %v480_v0 = vld [vmem:[#allocation5 + $0x38] sm:$0xff]  ;;  %v479_v1 = vld [vmem:[#allocation5 + $0x30] sm:$0xff] }
  0x14   :  { %158 = vmatpush.bf16.msra.mxu0 %v480_v0  ;;  %v488_v2 = vld [vmem:[#allocation7 + $0x38] sm:$0xff]  ;;  %v487_v3 = vld [vmem:[#allocation7 + $0x30] sm:$0xff]  ;;  %v478_v4 = vld [vmem:[#allocation5 + $0x28] sm:$0xff] }
  0x15   :  { %241 = vmatpush.bf16.msra.mxu1 %v488_v2  ;;  %v486_v5 = vld [vmem:[#allocation7 + $0x28] sm:$0xff]  ;;  %v477_v6 = vld [vmem:[#allocation5 + $0x20] sm:$0xff]  ;;  %v476_v8 = vld [vmem:[#allocation5 + $0x18] sm:$0xff] }
  0x16   :  { %v485_v7 = vld [vmem:[#allocation7 + $0x20] sm:$0xff]  ;;  %v484_v9 = vld [vmem:[#allocation7 + $0x18] sm:$0xff]  ;;  %v475_v10 = vld [vmem:[#allocation5 + $0x10] sm:$0xff] }
  0x17   :  { %v483_v11 = vld [vmem:[#allocation7 + $0x10] sm:$0xff]  ;;  %v474_v12 = vld [vmem:[#allocation5 + $0x8] sm:$0xff]  ;;  %v473_v13 = vld [vmem:[#allocation5] sm:$0xff] }
  0x18   :  { %159 = vmatpush.bf16.msra.mxu0 %v479_v1  ;;  %v88_v14 = vld [vmem:[#allocation2] sm:$0xff]  ;;  %v482_v16 = vld [vmem:[#allocation7 + $0x8] sm:$0xff]  ;;  %v481_v17 = vld [vmem:[#allocation7] sm:$0xff] }
  0x19   :  { %242 = vmatpush.bf16.msra.mxu1 %v487_v3  ;;  %v106_v15 = vpack.c.bf16 %v88_v14, %v88_v14  ;;  %v496_v18 = vld [vmem:[#allocation8 + $0x38] sm:$0xff]  ;;  %v495_v19 = vld [vmem:[#allocation8 + $0x30] sm:$0xff]  ;;  %v494_v20 = vld [vmem:[#allocation8 + $0x28] sm:$0xff] }
  0x1a   :  { %324 = vmatpush.bf16.msra.mxu2 %v496_v18  ;;  %v493_v21 = vld [vmem:[#allocation8 + $0x20] sm:$0xff]  ;;  %v492_v22 = vld [vmem:[#allocation8 + $0x18] sm:$0xff]  ;;  %v491_v23 = vld [vmem:[#allocation8 + $0x10] sm:$0xff] }
  0x1b   :  { %v504_v24 = vld [vmem:[%s712_s2] ss:$0 sm:$0xff]  ;;  %v490_v30 = vld [vmem:[#allocation8 + $0x8] sm:$0xff]  ;;  %v489_v31 = vld [vmem:[#allocation8] sm:$0xff] }
  0x1c   :  { %160 = vmatpush.bf16.msra.mxu0 %v478_v4  ;;  %v505_v32 = vld [vmem:[%s714_s4] ss:$0 sm:$0xff]  ;;  %s645_s4 = smov [#allocation10]  }
  0x1d   :  { %243 = vmatpush.bf16.msra.mxu1 %v486_v5  ;;  %v506_v38 = vld [vmem:[%s716_s6] ss:$0 sm:$0xff]  ;;  %s362_s24 = sshll.u32 %s645_s4, 4  ;;  %s364_s6 = sshll.u32 %s717_s7, 4  ;;  %s363_s24 = int_to_ptr.vmem [resolvable:$true] %s362_s24  ;;  %s365_s6 = int_to_ptr.hbm [resolvable:$true] %s364_s6 }
  0x1e   :  { %325 = vmatpush.bf16.msra.mxu2 %v495_v19 }
  0x20   :  { %161 = vmatpush.bf16.msra.mxu0 %v477_v6 }
  0x21   :  { %244 = vmatpush.bf16.msra.mxu1 %v485_v7 }
  0x22   :  { %326 = vmatpush.bf16.msra.mxu2 %v494_v20 }
  0x24   :  { %162 = vmatpush.bf16.msra.mxu0 %v476_v8 }
  0x25   :  { %245 = vmatpush.bf16.msra.mxu1 %v484_v9 }
  0x26   :  { %327 = vmatpush.bf16.msra.mxu2 %v493_v21 }
  0x28   :  { %163 = vmatpush.bf16.msra.mxu0 %v475_v10 }
  0x29   :  { %246 = vmatpush.bf16.msra.mxu1 %v483_v11 }
  0x2a   :  { %328 = vmatpush.bf16.msra.mxu2 %v492_v22 }
  0x2c   :  { %164 = vmatpush.bf16.msra.mxu0 %v474_v12 }
  0x2d   :  { %247 = vmatpush.bf16.msra.mxu1 %v482_v16 }
  0x2e   :  { %329 = vmatpush.bf16.msra.mxu2 %v491_v23 }
  0x30   :  { %165 = vmatpush.bf16.msra.mxu0 %v473_v13 }
  0x31   :  { %248 = vmatpush.bf16.msra.mxu1 %v481_v17 }
  0x32   :  { %330 = vmatpush.bf16.msra.mxu2 %v490_v30 }
  0x33   :  { %166 = vmatmul.bf16.vlgmr.msra.gmra.mxu0 %v106_v15 }
  0x36   :  { %331 = vmatpush.bf16.msra.mxu2 %v489_v31 }
  0xb0   :  { %v167_v25 = vpop.f32.mrf.mxu0 }
  0xb1   :  { %v168_v26 = vadd.f32 %v504_v24, %v167_v25 }
  0xb3   :  { %v171_v27 = vmax.f32 %v168_v26, 0.0 }
  0xb5   :  { %v189_v28 = vpack.c.bf16 %v171_v27, %v171_v27 }
  0xb7   :  { %249 = vmatmul.bf16.vlgmr.msra.gmra.mxu1 %v189_v28 }
  0xb8   :  { %v169_v29 = vpop.f32.mrf.mxu0 }
 0x134   :  { %v250_v33 = vpop.f32.mrf.mxu1 }
 0x135   :  { %v251_v34 = vadd.f32 %v505_v32, %v250_v33 }
 0x137   :  { %v254_v35 = vmax.f32 %v251_v34, 0.0 }
 0x139   :  { %v272_v36 = vpack.c.bf16 %v254_v35, %v254_v35 }
 0x13b   :  { %332 = vmatmul.bf16.vlgmr.msra.gmra.mxu2 %v272_v36 }
 0x13c   :  { %v252_v37 = vpop.f32.mrf.mxu1 }
 0x1be   :  { %v333_v39 = vpop.f32.mrf.mxu2 }
 0x1bf   :  { %v334_v40 = vadd.f32 %v506_v38, %v333_v39 }
 0x1c1   :  { %v472_v41 = vmul.f32 -1.442695, %v334_v40 }
 0x1c3   :  { %507 = vpow2.f32 %v472_v41 }
 0x1c6   :  { %v335_v42 = vpop.f32.mrf.mxu2 }
 0x1c9   :  { %v508_v43 = vpop.eup %507 }
 0x1ca   :  { %v340_v44 = vadd.f32 1.0, %v508_v43 }
 0x1cc   :  { %509 = vrcp.f32 %v340_v44  ;;  %v352_v48 = vand.u32 2147483648, %v340_v44  ;;  %v350_v50 = vand.u32 2147483647, %v340_v44  ;;  %vm346_vm1 = vweird.f32 %v340_v44 }
 0x1ce   :  { %v353_v52 = vor.u32 1.1754944e-38, %v352_v48  ;;  %vm351_vm3 = vcmp.eq.f32.partialorder %v350_v50, 8.507059e+37 }
 0x1d2   :  { %v510_v45 = vpop.eup %509 }
 0x1d3   :  { %v342_v46 = vmul.f32 %v510_v45, %v340_v44  ;;  %vm347_vm0 = vweird.f32 %v510_v45 }
 0x1d4   :  { %vm348_vm2 = vmor %vm346_vm1, %vm347_vm0 }
 0x1d5   :  { %v343_v47 = vsub.f32 1.0, %v342_v46 }
 0x1d7   :  { %v344_v49 = vmul.f32 %v510_v45, %v343_v47 }
 0x1d9   :  { %v345_v51 = vadd.f32 %v510_v45, %v344_v49 }
 0x1db   :  { %v349_v53 = vsel %vm348_vm2, %v510_v45, %v345_v51 }
 0x1dc   :  { %v354_v54 = vsel %vm351_vm3, %v353_v52, %v349_v53 }
 0x1dd   :  { %356 = vst [vmem:[#allocation10] sm:$0xff] %v354_v54 }
 0x1de   :  { %367 = dma.vmem_to_hbm [thread:$0]  %s363_s24, 128, %s365_s6, [#allocation4]  }
 0x1df   :  { %637 = dma.done.wait [#allocation4], 128  }
 0x1e0   :  { %638 = vsyncadd [#allocation4], 4294967168 }
 0x1e1   :  { %372 = vsyncpa [#allocation3], 1 }
 0x1e2   :  { %373 = vsyncpa [#allocation6], 1 }
 0x1e3   :  { %374 = vsyncpa [#allocation9], 1 }
 0x1e4   :  { %375 = vsyncpa [#allocation4], 1 }

</bundles_post_ra>
